<compile_context>
chip_gen: v6e
topology: v6e:2x2x1
jax: 0.10.0
libtpu: 0.0.40
codegen_flags: <defaults>
</compile_context>

<pallas_src>
import jax
import jax.numpy as jnp
from jax.experimental import pallas as pl
from jax.experimental.pallas import tpu as pltpu


def se_block_kernel(x_ref, w1t_ref, w2t_ref, o_ref):
    # x_ref / o_ref: (TB, C, HW) tile, lane-dense last axis.
    x = x_ref[...]
    hw = x.shape[-1]

    # --- squeeze: global average pool over flattened spatial axis ---
    # f32 accumulation fused per-vreg into the reduction (no f32 tile copy).
    # sum * (1/HW) instead of mean: stays correct if HW is ever zero-padded.
    pooled = jnp.sum(x, axis=-1, dtype=jnp.float32) * (1.0 / hw)      # (TB, C)

    # --- excitation: Linear(C -> hidden, no bias) + ReLU ---
    # Tiny GEMMs; >95% MXU padding but ~1e-4 of the work, hidden under DMA.
    h = jnp.maximum(
        jnp.dot(pooled, w1t_ref[...], preferred_element_type=jnp.float32),
        0.0)                                                          # (TB, hidden)

    # --- Linear(hidden -> C, no bias) + Sigmoid ---
    gate = jax.nn.sigmoid(
        jnp.dot(h, w2t_ref[...], preferred_element_type=jnp.float32)  # (TB, C)
    ).astype(x.dtype)

    # --- scale: broadcast per-channel gate over the spatial axis ---
    o_ref[...] = (x * gate[:, :, None]).astype(o_ref.dtype)


def _largest_divisor_at_most(n, cap):
    cap = max(1, min(n, cap))
    for d in range(cap, 0, -1):
        if n % d == 0:
            return d
    return 1


def se_block(x, w1, w2, *, tb=None, vmem_target_bytes=8 * 1024 * 1024,
             donate_x=False):
    """SEBlock forward.

    x:  (B, C, H, W)
    w1: (hidden, C)   -- PyTorch Linear layout (out_features, in_features)
    w2: (C, hidden)
    donate_x: alias x's HBM buffer for the output (caller must not reuse x).
    """
    B, C, H, W = x.shape
    HW = H * W
    hidden = w1.shape[0]

    # Lane-dense layout: flatten spatial dims (free view on contiguous NCHW).
    x_flat = x.reshape(B, C, HW)

    bytes_per_row = C * HW * x.dtype.itemsize
    if tb is None:
        # Largest divisor of B whose tile fits the per-buffer VMEM target.
        # Divisor (not cdiv) => no batch padding, no full-tensor pad/slice copy.
        tb = _largest_divisor_at_most(B, max(1, vmem_target_bytes // bytes_per_row))
    elif B % tb != 0:
        tb = _largest_divisor_at_most(B, tb)
    grid_b = B // tb

    w1t = w1.T  # (C, hidden)
    w2t = w2.T  # (hidden, C)

    tile_bytes = tb * bytes_per_row
    weight_bytes = (w1t.size * w1t.dtype.itemsize +
                    w2t.size * w2t.dtype.itemsize)
    # input + output tiles, each double-buffered, + (double-buffered) weights
    # + headroom.  Explicit limit so large tiles also work on v5e's 16 MiB
    # scoped default; ~8 MiB tiles keep this ~36 MiB, inside v7x's 64 MiB.
    vmem_limit = int(4 * tile_bytes + 4 * weight_bytes + (4 << 20))
    vmem_limit = max(vmem_limit, 32 << 20)
    # TODO(synk): if a single batch row alone exceeds ~12 MiB (e.g. the spec's
    # 1x256x160x160 f32 => ~26 MiB/row), this still fits v5e/v6e (128 MiB
    # physical VMEM) but a spatially-tiled two-pass (pool, then scale) variant
    # would be needed to fit v7x's 64 MiB VMEM.

    itemsize = x.dtype.itemsize
    cost = pl.CostEstimate(
        flops=2 * B * C * HW + 4 * B * C * hidden,   # pool + scale + tiny GEMMs
        transcendentals=B * C,                        # sigmoid
        bytes_accessed=2 * B * C * HW * itemsize + weight_bytes,
    )

    out = pl.pallas_call(
        se_block_kernel,
        out_shape=jax.ShapeDtypeStruct((B, C, HW), x.dtype),
        grid_spec=pltpu.PrefetchScalarGridSpec(
            num_scalar_prefetch=0,
            grid=(grid_b,),
            in_specs=[
                pl.BlockSpec((tb, C, HW), lambda b: (b, 0, 0)),
                pl.BlockSpec((C, hidden), lambda b: (0, 0)),
                pl.BlockSpec((hidden, C), lambda b: (0, 0)),
            ],
            out_specs=pl.BlockSpec((tb, C, HW), lambda b: (b, 0, 0)),
        ),
        compiler_params=pltpu.CompilerParams(
            dimension_semantics=("parallel",),
            vmem_limit_bytes=vmem_limit,
        ),
        cost_estimate=cost,
        input_output_aliases=({0: 0} if donate_x else {}),
    )(x_flat, w1t, w2t)

    return out.reshape(B, C, H, W)


def se_block_ref(x, w1, w2):
    """Pure-JAX reference matching the PyTorch module."""
    y = jnp.mean(x, axis=(2, 3))                 # (B, C)
    y = jnp.maximum(y @ w1.T, 0.0)               # (B, hidden)
    y = jax.nn.sigmoid(y @ w2.T)                 # (B, C)
    return x * y[:, :, None, None]


if __name__ == "__main__":
    # Small shapes consistent with SEBlock(channel=C, reduction=16)
    B, C, H, W = 4, 64, 16, 16
    reduction = 16
    hidden = C // reduction

    key = jax.random.PRNGKey(0)
    kx, k1, k2 = jax.random.split(key, 3)

    x = jax.random.uniform(kx, (B, C, H, W), dtype=jnp.float32)
    # PyTorch Linear layout: (out_features, in_features), bias-free
    w1 = jax.random.normal(k1, (hidden, C), dtype=jnp.float32) * 0.1
    w2 = jax.random.normal(k2, (C, hidden), dtype=jnp.float32) * 0.1

    out = jax.block_until_ready(se_block(x, w1, w2))
    ref = se_block_ref(x, w1, w2)

    assert out.shape == (B, C, H, W)
    assert jnp.allclose(out, ref, atol=1e-5, rtol=1e-5), "mismatch vs reference"

    print("KERNEL_OK")
</pallas_src>

<mosaic_0001>
module attributes {stable_mosaic.version = 11 : i64} {
  func.func @se_block_kernel(%arg0: i32, %arg1: memref<4x64x256xf32, #tpu.memory_space<vmem>>, %arg2: memref<64x4xf32, #tpu.memory_space<vmem>>, %arg3: memref<4x64xf32, #tpu.memory_space<vmem>>, %arg4: memref<4x64x256xf32, #tpu.memory_space<vmem>>) attributes {dimension_semantics = [#tpu.dimension_semantics<parallel>], iteration_bounds = array<i64: 1>, scalar_prefetch = 0 : i64, scratch_operands = 0 : i64, tpu.core_type = #tpu.core_type<tc>, window_params = [{transform_indices = @transform_0, window_bounds = array<i64: 4, 64, 256>}, {pipeline_mode = #tpu.pipeline_mode<synchronous>, transform_indices = @transform_1, window_bounds = array<i64: 64, 4>}, {pipeline_mode = #tpu.pipeline_mode<synchronous>, transform_indices = @transform_2, window_bounds = array<i64: 4, 64>}, {transform_indices = @transform_3, window_bounds = array<i64: 4, 64, 256>}]} {
    %c0 = arith.constant 0 : index
    %c0_0 = arith.constant 0 : index
    %c0_1 = arith.constant 0 : index
    %0 = vector.load %arg1[%c0, %c0_0, %c0_1] : memref<4x64x256xf32, #tpu.memory_space<vmem>>, vector<4x64x256xf32>
    %cst = arith.constant dense<0.000000e+00> : vector<4x64xf32>
    %1 = vector.multi_reduction <add>, %0, %cst [2] : vector<4x64x256xf32> to vector<4x64xf32>
    %cst_2 = arith.constant 3.906250e-03 : f32
    %2 = vector.broadcast %cst_2 : f32 to vector<4x64xf32>
    %3 = arith.mulf %1, %2 : vector<4x64xf32>
    %c0_3 = arith.constant 0 : index
    %c0_4 = arith.constant 0 : index
    %4 = vector.load %arg2[%c0_3, %c0_4] : memref<64x4xf32, #tpu.memory_space<vmem>>, vector<64x4xf32>
    %cst_5 = arith.constant dense<0.000000e+00> : vector<4x4xf32>
    %5 = tpu.matmul %3, %4, %cst_5 {dimension_numbers = #tpu.dot_dimension_numbers<[1], [0], [0], [1], [0, 0, 1, 1], [], []>} : vector<4x64xf32>, vector<64x4xf32>, vector<4x4xf32> -> vector<4x4xf32>
    %cst_6 = arith.constant 0.000000e+00 : f32
    %6 = vector.broadcast %cst_6 : f32 to vector<4x4xf32>
    %7 = arith.maximumf %5, %6 : vector<4x4xf32>
    %c0_7 = arith.constant 0 : index
    %c0_8 = arith.constant 0 : index
    %8 = vector.load %arg3[%c0_7, %c0_8] : memref<4x64xf32, #tpu.memory_space<vmem>>, vector<4x64xf32>
    %cst_9 = arith.constant dense<0.000000e+00> : vector<4x64xf32>
    %9 = tpu.matmul %7, %8, %cst_9 {dimension_numbers = #tpu.dot_dimension_numbers<[1], [0], [0], [1], [0, 0, 1, 1], [], []>} : vector<4x4xf32>, vector<4x64xf32>, vector<4x64xf32> -> vector<4x64xf32>
    %10 = arith.negf %9 : vector<4x64xf32>
    %11 = math.exp %10 : vector<4x64xf32>
    %cst_10 = arith.constant 1.000000e+00 : f32
    %12 = vector.broadcast %cst_10 : f32 to vector<4x64xf32>
    %13 = arith.addf %12, %11 : vector<4x64xf32>
    %14 = arith.divf %12, %13 : vector<4x64xf32>
    %15 = vector.shape_cast %14 : vector<4x64xf32> to vector<4x64x1xf32>
    %16 = vector.broadcast %15 : vector<4x64x1xf32> to vector<4x64x256xf32>
    %17 = arith.mulf %0, %16 : vector<4x64x256xf32>
    %c0_11 = arith.constant 0 : index
    %c0_12 = arith.constant 0 : index
    %c0_13 = arith.constant 0 : index
    %18 = vector.load %arg4[%c0_11, %c0_12, %c0_13] : memref<4x64x256xf32, #tpu.memory_space<vmem>>, vector<4x64x256xf32>
    tpu.vector_store %arg4[%c0_11, %c0_12, %c0_13], %17 {strides = array<i32>} : memref<4x64x256xf32, #tpu.memory_space<vmem>>, vector<4x64x256xf32>,
    return
  }
  func.func @transform_0(%arg0: i32) -> (i32, i32, i32) {
    %c0_i32 = arith.constant 0 : i32
    %c0_i32_0 = arith.constant 0 : i32
    %c0_i32_1 = arith.constant 0 : i32
    return %arg0, %c0_i32, %c0_i32_0 : i32, i32, i32
  }
  func.func @transform_1(%arg0: i32) -> (i32, i32) {
    %c0_i32 = arith.constant 0 : i32
    %c0_i32_0 = arith.constant 0 : i32
    %c0_i32_1 = arith.constant 0 : i32
    return %c0_i32, %c0_i32_0 : i32, i32
  }
  func.func @transform_2(%arg0: i32) -> (i32, i32) {
    %c0_i32 = arith.constant 0 : i32
    %c0_i32_0 = arith.constant 0 : i32
    %c0_i32_1 = arith.constant 0 : i32
    return %c0_i32, %c0_i32_0 : i32, i32
  }
  func.func @transform_3(%arg0: i32) -> (i32, i32, i32) {
    %c0_i32 = arith.constant 0 : i32
    %c0_i32_0 = arith.constant 0 : i32
    %c0_i32_1 = arith.constant 0 : i32
    return %arg0, %c0_i32, %c0_i32_0 : i32, i32, i32
  }
}

</mosaic_0001>

<bundles_post_ra>
// kernel: tpu_custom_call.1
= control target key start
LH: loop header
LB: loop body
LE: loop exit
PB: predicated region body
PF: predicated region fallthrough
CT: control target
= control target key end

     0   :  { %8 = vsyncpa [#allocation3], 0  ;;  %s1407_s0 = inlined_call_operand.hbm [shape: f32[4,64,256], index: 0, kind: input, shape index: {}]   ;;  %s1408_s1 = inlined_call_operand.vmem [shape: f32[64,4], index: 1, kind: input, shape index: {}]   ;;  %s1409_s2 = inlined_call_operand.vmem [shape: f32[4,64], index: 2, kind: input, shape index: {}]   ;;  %s1410_s3 = inlined_call_operand.hbm [shape: f32[4,64,256], index: 3, kind: output, shape index: {}]  }
   0x1   :  { %9 = vsyncpa [#allocation4], 0  ;;  %s976_s12 = smov [#allocation2]  }
   0x2   :  { %s15_s13 = sshll.u32 %s976_s12, 4  ;;  %s16_s13 = int_to_ptr.vmem [resolvable:$true] %s15_s13 }
   0x3   :  { %s940_s14 = scalar_lea.vmem %s16_s13, 8192  ;;  %p945_p1 = scmp.lt.s32.totalorder %s16_s13, %s16_s13 }
   0x4   :  { %p941_p0 = scmp.ne.s32.totalorder %s16_s13, %s940_s14  ;;  %p946_p2 = scmp.lt.s32.totalorder %s940_s14, %s940_s14 }
   0x6   :  { %p947_p3 = por %p946_p2, %p945_p1 }
   0x8   :  { %p948_p4 = pnand %p947_p3, %p941_p0 }
   0xa   :  { %951 = shalt.err (!%p948_p4)
}
   0xb   :  { %s977_s15 = smov 256   ;;  %s978_s16 = smov 16  }
   0xc   :  { %21 = dma.hbm_to_vmem [thread:$0]  %s1407_s0, 8192, %s16_s13, [#allocation3], %s977_s15, %s977_s15, %s978_s16  }
   0xd   :  { %972 = dma.done.wait [#allocation3], 8192  }
   0xe   :  { %973 = vsyncadd [#allocation3], 4294959104  ;;  %v1008_v0 = vld [vmem:[#allocation2 + $0x80] sm:$0xff]  ;;  %v1010_v1 = vld [vmem:[#allocation2 + $0x88] sm:$0xff]  ;;  %vm980_vm0 = vmmov 0   ;;  %vm272_vm1 = vcmask 130112  }
   0xf   :  { %v1012_v2 = vld [vmem:[#allocation2] sm:$0xff]  ;;  %v117_v3 = vadd.f32 %v1010_v1, %v1008_v0  ;;  %v1016_v4 = vld [vmem:[#allocation2 + $0x8] sm:$0xff]  ;;  %v1018_v5 = vld [vmem:[#allocation2 + $0x90] sm:$0xff]  ;;  %vm279_vm2 = vcmask 195712   ;;  %vm286_vm3 = vcmask 261312   ;;  %vm293_vm4 = vcmask 326912  }
  0x10   :  { %1456 = vst [vmem:[#allocation8_spill] sm:$0xff] %v1018_v5  ;;  %v1020_v6 = vld [vmem:[#allocation2 + $0x98] sm:$0xff]  ;;  %v93_v7 = vadd.f32 %v1016_v4, %v1012_v2  ;;  %v1024_v8 = vld [vmem:[#allocation2 + $0x10] sm:$0xff]  ;;  %v1032_v12 = vld [vmem:[#allocation2 + $0xa0] sm:$0xff]  ;;  %vm300_vm5 = vcmask 392512   ;;  %vm307_vm6 = vcmask 458112  }
  0x11   :  { %1457 = vst [vmem:[#allocation9_spill] sm:$0xff] %v1020_v6  ;;  %v1026_v9 = vld [vmem:[#allocation2 + $0x18] sm:$0xff]  ;;  %118 = vadd.xlane.f32.xlu1 %v117_v3  ;;  %v120_v10 = vadd.f32 %v1020_v6, %v1018_v5  ;;  %v1034_v13 = vld [vmem:[#allocation2 + $0xa8] sm:$0xff]  ;;  %v1036_v14 = vld [vmem:[#allocation2 + $0x20] sm:$0xff]  ;;  %vm314_vm7 = vcmask 523712   ;;  %vm433_vm8 = vcmask 1041409  }
  0x12   :  { %94 = vadd.xlane.f32.xlu0 %v93_v7  ;;  %v96_v11 = vadd.f32 %v1026_v9, %v1024_v8  ;;  %1458 = vst [vmem:[#allocation10_spill] sm:$0xff] %v1034_v13  ;;  %v1038_v15 = vld [vmem:[#allocation2 + $0x28] sm:$0xff]  ;;  %v123_v16 = vadd.f32 %v1034_v13, %v1032_v12  ;;  %v1044_v18 = vld [vmem:[#allocation2 + $0x110] sm:$0xff]  ;;  %v1046_v19 = vld [vmem:[#allocation2 + $0x118] sm:$0xff]  ;;  %vm435_vm9 = vcmask 1042434   ;;  %vm437_vm10 = vcmask 1043459  }
  0x13   :  { %v99_v17 = vadd.f32 %v1038_v15, %v1036_v14  ;;  %1459 = vst [vmem:[#allocation11_spill] sm:$0xff] %v1044_v18  ;;  %1460 = vst [vmem:[#allocation12_spill] sm:$0xff] %v1046_v19  ;;  %v1048_v20 = vld [vmem:[#allocation2 + $0x100] sm:$0xff]  ;;  %v1050_v21 = vld [vmem:[#allocation2 + $0x108] sm:$0xff]  ;;  %v144_v22 = vadd.f32 %v1046_v19, %v1044_v18  ;;  %vm439_vm11 = vcmask 523264   ;;  %vm518_vm12 = vcmask 1043456  }
  0x14   :  { %1461 = vst [vmem:[#allocation13_spill] sm:$0xff] %v1048_v20  ;;  %1462 = vst [vmem:[#allocation14_spill] sm:$0xff] %v1050_v21  ;;  %v141_v23 = vadd.f32 %v1050_v21, %v1048_v20  ;;  %v1056_v24 = vld [vmem:[#allocation2 + $0xb0] sm:$0xff]  ;;  %v1058_v25 = vld [vmem:[#allocation2 + $0xb8] sm:$0xff]  ;;  %vm514_vm13 = vcmask 31744  }
  0x15   :  { %121 = vadd.xlane.f32.xlu1 %v120_v10  ;;  %1463 = vst [vmem:[#allocation15_spill] sm:$0xff] %v1056_v24  ;;  %1464 = vst [vmem:[#allocation16_spill] sm:$0xff] %v1058_v25  ;;  %v1060_v26 = vld [vmem:[#allocation2 + $0x30] sm:$0xff]  ;;  %v1062_v27 = vld [vmem:[#allocation2 + $0x38] sm:$0xff]  ;;  %v126_v28 = vadd.f32 %v1058_v25, %v1056_v24 }
  0x16   :  { %97 = vadd.xlane.f32.xlu0 %v96_v11  ;;  %v102_v29 = vadd.f32 %v1062_v27, %v1060_v26  ;;  %v1068_v30 = vld [vmem:[#allocation2 + $0x180] sm:$0xff]  ;;  %v1070_v31 = vld [vmem:[#allocation2 + $0x188] sm:$0xff]  ;;  %v1084_v38 = vld [vmem:[#allocation2 + $0x190] sm:$0xff] }
  0x17   :  { %1465 = vst [vmem:[#allocation17_spill] sm:$0xff] %v1068_v30  ;;  %1466 = vst [vmem:[#allocation18_spill] sm:$0xff] %v1070_v31  ;;  %v1072_v32 = vld [vmem:[#allocation2 + $0x120] sm:$0xff]  ;;  %v1074_v33 = vld [vmem:[#allocation2 + $0x128] sm:$0xff]  ;;  %v165_v34 = vadd.f32 %v1070_v31, %v1068_v30  ;;  %v261_v30 = vlaneseq }
  0x18   :  { %1467 = vst [vmem:[#allocation19_spill] sm:$0xff] %v1072_v32  ;;  %1468 = vst [vmem:[#allocation20_spill] sm:$0xff] %v1074_v33  ;;  %v147_v35 = vadd.f32 %v1074_v33, %v1072_v32  ;;  %v1080_v36 = vld [vmem:[#allocation2 + $0x40] sm:$0xff]  ;;  %v1082_v37 = vld [vmem:[#allocation2 + $0x48] sm:$0xff] }
  0x19   :  { %124 = vadd.xlane.f32.xlu1 %v123_v16  ;;  %1469 = vst [vmem:[#allocation21_spill] sm:$0xff] %v1084_v38  ;;  %v1086_v39 = vld [vmem:[#allocation2 + $0x198] sm:$0xff]  ;;  %v105_v40 = vadd.f32 %v1082_v37, %v1080_v36  ;;  %v1092_v42 = vld [vmem:[#allocation2 + $0x130] sm:$0xff]  ;;  %v1096_v44 = vld [vmem:[#allocation2 + $0xc0] sm:$0xff] }
  0x1a   :  { %100 = vadd.xlane.f32.xlu0 %v99_v17  ;;  %1470 = vst [vmem:[#allocation22_spill] sm:$0xff] %v1086_v39  ;;  %v168_v41 = vadd.f32 %v1086_v39, %v1084_v38  ;;  %1471 = vst [vmem:[#allocation23_spill] sm:$0xff] %v1092_v42  ;;  %v1094_v43 = vld [vmem:[#allocation2 + $0x138] sm:$0xff]  ;;  %v1098_v45 = vld [vmem:[#allocation2 + $0xc8] sm:$0xff] }
  0x1b   :  { %1472 = vst [vmem:[#allocation24_spill] sm:$0xff] %v1094_v43  ;;  %1473 = vst [vmem:[#allocation25_spill] sm:$0xff] %v1096_v44  ;;  %v150_v46 = vadd.f32 %v1094_v43, %v1092_v42  ;;  %v129_v47 = vadd.f32 %v1098_v45, %v1096_v44  ;;  %v1104_v48 = vld [vmem:[#allocation2 + $0x50] sm:$0xff]  ;;  %v1106_v49 = vld [vmem:[#allocation2 + $0x58] sm:$0xff] }
  0x1c   :  { %1474 = vst [vmem:[#allocation26_spill] sm:$0xff] %v1098_v45  ;;  %v1108_v50 = vld [vmem:[#allocation2 + $0x1a0] sm:$0xff]  ;;  %v1110_v51 = vld [vmem:[#allocation2 + $0x1a8] sm:$0xff]  ;;  %v108_v52 = vadd.f32 %v1106_v49, %v1104_v48  ;;  %v1120_v56 = vld [vmem:[#allocation2 + $0xd0] sm:$0xff] }
  0x1d   :  { %145 = vadd.xlane.f32.xlu1 %v144_v22  ;;  %1475 = vst [vmem:[#allocation27_spill] sm:$0xff] %v1108_v50  ;;  %1476 = vst [vmem:[#allocation28_spill] sm:$0xff] %v1110_v51  ;;  %v171_v53 = vadd.f32 %v1110_v51, %v1108_v50  ;;  %v1116_v54 = vld [vmem:[#allocation2 + $0x140] sm:$0xff]  ;;  %v1118_v55 = vld [vmem:[#allocation2 + $0x148] sm:$0xff] }
  0x1e   :  { %142 = vadd.xlane.f32.xlu0 %v141_v23  ;;  %1477 = vst [vmem:[#allocation29_spill] sm:$0xff] %v1116_v54  ;;  %1478 = vst [vmem:[#allocation30_spill] sm:$0xff] %v1118_v55  ;;  %v1122_v57 = vld [vmem:[#allocation2 + $0xd8] sm:$0xff]  ;;  %v153_v58 = vadd.f32 %v1118_v55, %v1116_v54  ;;  %v1128_v60 = vld [vmem:[#allocation2 + $0x60] sm:$0xff] }
  0x1f   :  { %1479 = vst [vmem:[#allocation31_spill] sm:$0xff] %v1120_v56  ;;  %1480 = vst [vmem:[#allocation32_spill] sm:$0xff] %v1122_v57  ;;  %v132_v59 = vadd.f32 %v1122_v57, %v1120_v56  ;;  %v1130_v61 = vld [vmem:[#allocation2 + $0x68] sm:$0xff]  ;;  %v1132_v62 = vld [vmem:[#allocation2 + $0x1b0] sm:$0xff] }
  0x20   :  { %1481 = vst [vmem:[#allocation33_spill] sm:$0xff] %v1132_v62  ;;  %v1134_v63 = vld [vmem:[#allocation2 + $0x1b8] sm:$0xff]  ;;  %v111_v3 = vadd.f32 %v1130_v61, %v1128_v60  ;;  %v1140_v10 = vld [vmem:[#allocation2 + $0x150] sm:$0xff]  ;;  %v1144_v16 = vld [vmem:[#allocation2 + $0xe0] sm:$0xff] }
  0x21   :  { %127 = vadd.xlane.f32.xlu1 %v126_v28  ;;  %1482 = vst [vmem:[#allocation34_spill] sm:$0xff] %v1134_v63  ;;  %v174_v7 = vadd.f32 %v1134_v63, %v1132_v62  ;;  %1483 = vst [vmem:[#allocation35_spill] sm:$0xff] %v1140_v10  ;;  %v1142_v11 = vld [vmem:[#allocation2 + $0x158] sm:$0xff]  ;;  %v1146_v17 = vld [vmem:[#allocation2 + $0xe8] sm:$0xff] }
  0x22   :  { %103 = vadd.xlane.f32.xlu0 %v102_v29  ;;  %1484 = vst [vmem:[#allocation36_spill] sm:$0xff] %v1142_v11  ;;  %1485 = vst [vmem:[#allocation37_spill] sm:$0xff] %v1144_v16  ;;  %v156_v22 = vadd.f32 %v1142_v11, %v1140_v10  ;;  %v135_v23 = vadd.f32 %v1146_v17, %v1144_v16  ;;  %v1152_v28 = vld [vmem:[#allocation2 + $0x70] sm:$0xff]  ;;  %v1154_v29 = vld [vmem:[#allocation2 + $0x78] sm:$0xff] }
  0x23   :  { %1486 = vst [vmem:[#allocation38_spill] sm:$0xff] %v1146_v17  ;;  %v1190_v62 = vld [vmem:[#allocation2 + $0x1f8] sm:$0xff] }
  0x24   :  { %1498 = vst [vmem:[#allocation50_spill] sm:$0xff] %v1190_v62 }
  0x25   :  { %166 = vadd.xlane.f32.xlu1 %v165_v34  ;;  %v1156_v34 = vld [vmem:[#allocation2 + $0x1c0] sm:$0xff] }
  0x26   :  { %148 = vadd.xlane.f32.xlu0 %v147_v35  ;;  %1487 = vst [vmem:[#allocation39_spill] sm:$0xff] %v1156_v34  ;;  %v1158_v35 = vld [vmem:[#allocation2 + $0x1c8] sm:$0xff] }
  0x27   :  { %1488 = vst [vmem:[#allocation40_spill] sm:$0xff] %v1158_v35 }
  0x29   :  { %106 = vadd.xlane.f32.xlu1 %v105_v40  ;;  %v114_v40 = vadd.f32 %v1154_v29, %v1152_v28 }
  0x2a   :  { %169 = vadd.xlane.f32.xlu0 %v168_v41  ;;  %v177_v41 = vadd.f32 %v1158_v35, %v1156_v34  ;;  %v1192_v35 = vld [vmem:[#allocation2 + $0x1e0] sm:$0xff]  ;;  %v1194_v34 = vld [vmem:[#allocation2 + $0x1e8] sm:$0xff] }
  0x2b   :  { %1499 = vst [vmem:[#allocation51_spill] sm:$0xff] %v1192_v35  ;;  %1500 = vst [vmem:[#allocation52_spill] sm:$0xff] %v1194_v34 }
  0x2d   :  { %151 = vadd.xlane.f32.xlu1 %v150_v46  ;;  %v1164_v46 = vld [vmem:[#allocation2 + $0x160] sm:$0xff] }
  0x2e   :  { %130 = vadd.xlane.f32.xlu0 %v129_v47  ;;  %1489 = vst [vmem:[#allocation41_spill] sm:$0xff] %v1164_v46  ;;  %v1166_v47 = vld [vmem:[#allocation2 + $0x168] sm:$0xff] }
  0x2f   :  { %1490 = vst [vmem:[#allocation42_spill] sm:$0xff] %v1166_v47 }
  0x31   :  { %109 = vadd.xlane.f32.xlu1 %v108_v52  ;;  %v1168_v52 = vld [vmem:[#allocation2 + $0xf0] sm:$0xff] }
  0x32   :  { %172 = vadd.xlane.f32.xlu0 %v171_v53  ;;  %1491 = vst [vmem:[#allocation43_spill] sm:$0xff] %v1168_v52  ;;  %v1170_v53 = vld [vmem:[#allocation2 + $0xf8] sm:$0xff] }
  0x33   :  { %1492 = vst [vmem:[#allocation44_spill] sm:$0xff] %v1170_v53 }
  0x35   :  { %154 = vadd.xlane.f32.xlu1 %v153_v58  ;;  %v159_v58 = vadd.f32 %v1166_v47, %v1164_v46  ;;  %v1228_v47 = vshrl.u32 %v261_v30, 7 }
  0x36   :  { %133 = vadd.xlane.f32.xlu0 %v132_v59  ;;  %v138_v59 = vadd.f32 %v1170_v53, %v1168_v52 }
  0x39   :  { %112 = vadd.xlane.f32.xlu1 %v111_v3  ;;  %v1176_v3 = vld [vmem:[#allocation2 + $0x170] sm:$0xff] }
  0x3a   :  { %175 = vadd.xlane.f32.xlu0 %v174_v7  ;;  %1493 = vst [vmem:[#allocation45_spill] sm:$0xff] %v1176_v3  ;;  %v1178_v7 = vld [vmem:[#allocation2 + $0x178] sm:$0xff] }
  0x3b   :  { %1494 = vst [vmem:[#allocation46_spill] sm:$0xff] %v1178_v7  ;;  %v162_v63 = vadd.f32 %v1178_v7, %v1176_v3 }
  0x3d   :  { %157 = vadd.xlane.f32.xlu1 %v156_v22  ;;  %v1180_v22 = vld [vmem:[#allocation2 + $0x1d0] sm:$0xff] }
  0x3e   :  { %136 = vadd.xlane.f32.xlu0 %v135_v23  ;;  %1495 = vst [vmem:[#allocation47_spill] sm:$0xff] %v1180_v22  ;;  %v1182_v23 = vld [vmem:[#allocation2 + $0x1d8] sm:$0xff] }
  0x3f   :  { %1496 = vst [vmem:[#allocation48_spill] sm:$0xff] %v1182_v23 }
  0x41   :  { %115 = vadd.xlane.f32.xlu1 %v114_v40  ;;  %v180_v40 = vadd.f32 %v1182_v23, %v1180_v22  ;;  %v228_v23 = vld [vmem:[%s1408_s1 + $0x38] sm:$0xff] }
  0x42   :  { %178 = vadd.xlane.f32.xlu0 %v177_v41  ;;  %v1188_v41 = vld [vmem:[#allocation2 + $0x1f0] sm:$0xff] }
  0x43   :  { %1497 = vst [vmem:[#allocation49_spill] sm:$0xff] %v1188_v41  ;;  %v186_v39 = vadd.f32 %v1190_v62, %v1188_v41 }
  0x45   :  { %160 = vadd.xlane.f32.xlu1 %v159_v58  ;;  %v183_v58 = vadd.f32 %v1194_v34, %v1192_v35 }
  0x46   :  { %139 = vadd.xlane.f32.xlu0 %v138_v59  ;;  %v979_v59 = vmov 0.0  }
  0x47   :  { %898 = vmatprep.subr.mxu0 %v979_v59  ;;  %917 = vmatprep.subr.mxu1 %v979_v59 }
  0x48   :  { %899 = vmatpush3.msra.mxu0 %v228_v23  ;;  %v224_v23 = vld [vmem:[%s1408_s1 + $0x18] sm:$0xff]  ;;  %914 = vmatprep.mubr.msk.f32.mxu0 %vm980_vm0, %v979_v59 }
  0x49   :  { %163 = vadd.xlane.f32.xlu1 %v162_v63  ;;  %900 = vmatprep.subr.mxu0 %v979_v59  ;;  %v227_v63 = vld [vmem:[%s1408_s1 + $0x30] sm:$0xff] }
  0x4a   :  { %181 = vadd.xlane.f32.xlu0 %v180_v40  ;;  %901 = vmatpush3.msra.mxu0 %v227_v63  ;;  %v225_v40 = vld [vmem:[%s1408_s1 + $0x20] sm:$0xff]  ;;  %v222_v63 = vld [vmem:[%s1408_s1 + $0x8] sm:$0xff] }
  0x4b   :  { %902 = vmatprep.subr.mxu0 %v979_v59  ;;  %919 = vmatprep.mubr.msk.f32.mxu1 %vm980_vm0, %v979_v59 }
  0x4d   :  { %187 = vadd.xlane.f32.xlu1 %v186_v39  ;;  %v226_v39 = vld [vmem:[%s1408_s1 + $0x28] sm:$0xff] }
  0x4e   :  { %184 = vadd.xlane.f32.xlu0 %v183_v58  ;;  %903 = vmatpush3.msra.mxu0 %v226_v39  ;;  %v223_v58 = vld [vmem:[%s1408_s1 + $0x10] sm:$0xff]  ;;  %v221_v39 = vld [vmem:[%s1408_s1] sm:$0xff] }
  0x4f   :  { %904 = vmatprep.subr.mxu0 %v979_v59 }
  0x50   :  { %905 = vmatpush3.msra.mxu0 %v225_v40 }
  0x51   :  { %906 = vmatprep.subr.mxu0 %v979_v59 }
  0x52   :  { %907 = vmatpush3.msra.mxu0 %v224_v23 }
  0x53   :  { %908 = vmatprep.subr.mxu0 %v979_v59 }
  0x54   :  { %909 = vmatpush3.msra.mxu0 %v223_v58 }
  0x55   :  { %910 = vmatprep.subr.mxu0 %v979_v59 }
  0x56   :  { %911 = vmatpush3.msra.mxu0 %v222_v63 }
  0x57   :  { %912 = vmatprep.subr.mxu0 %v979_v59  ;;  %v262_v59 = vand.u32 127, %v261_v30 }
  0x58   :  { %913 = vmatpush3.msra.mxu0 %v221_v39 }
  0x59   :  { %v267_v46 = vadd.s32 4294967288, %v262_v59  ;;  %v274_v43 = vadd.s32 4294967280, %v262_v59  ;;  %v281_v55 = vadd.s32 4294967272, %v262_v59  ;;  %v288_v54 = vadd.s32 4294967264, %v262_v59 }
  0x5a   :  { %v1235_v18 = vsub.s32 %v262_v59, %v1228_v47  ;;  %v295_v30 = vadd.s32 4294967256, %v262_v59  ;;  %v302_v53 = vadd.s32 4294967248, %v262_v59 }
  0x5b   :  { %v1238_v33 = vsub.s32 %v267_v46, %v1228_v47  ;;  %v1241_v32 = vsub.s32 %v274_v43, %v1228_v47  ;;  %v1246_v20 = vsub.s32 %v281_v55, %v1228_v47  ;;  %v1249_v57 = vsub.s32 %v288_v54, %v1228_v47 }
  0x5c   :  { %v1257_v55 = vsub.s32 %v302_v53, %v1228_v47 }
  0x9a   :  { %v119_v40 = vpop.xlane.xlu1 %118 }
  0x9b   :  { %v95_v23 = vpop.xlane.xlu0 %94  ;;  %v197_v46 = vmul.f32 0.00390625, %v119_v40 }
  0x9c   :  { %v189_v44 = vmul.f32 0.00390625, %v95_v23 }
  0x9e   :  { %v122_v62 = vpop.xlane.xlu1 %121 }
  0x9f   :  { %v98_v41 = vpop.xlane.xlu0 %97  ;;  %v198_v21 = vmul.f32 0.00390625, %v122_v62  ;;  %v1254_v62 = vsub.s32 %v295_v30, %v1228_v47 }
  0xa0   :  { %v190_v17 = vmul.f32 0.00390625, %v98_v41 }
  0xa1   :  { %v323_v5 = vrot.slane %v198_v21, %v1238_v33  ;;  %v266_v21 = vrot.slane %v189_v44, %v1235_v18 }
  0xa2   :  { %v125_v58 = vpop.xlane.xlu1 %124 }
  0xa3   :  { %v101_v22 = vpop.xlane.xlu0 %100  ;;  %v199_v16 = vmul.f32 0.00390625, %v125_v58  ;;  %v309_v58 = vadd.s32 4294967240, %v262_v59 }
  0xa4   :  { %v191_v43 = vmul.f32 0.00390625, %v101_v22  ;;  %v319_v22 = vrot.slane %v197_v46, %v1235_v18 }
  0xa6   :  { %v146_v34 = vpop.xlane.xlu1 %145 }
  0xa7   :  { %v143_v35 = vpop.xlane.xlu0 %142  ;;  %v206_v25 = vmul.f32 0.00390625, %v146_v34  ;;  %v271_v34 = vrot.slane %v190_v17, %v1238_v33  ;;  %v324_v17 = vsel %vm272_vm1, %v323_v5, %v319_v22 }
  0xa8   :  { %v205_v24 = vmul.f32 0.00390625, %v143_v35  ;;  %v278_v35 = vrot.slane %v191_v43, %v1241_v32 }
  0xa9   :  { %v362_v23 = vrot.slane %v206_v25, %v1238_v33 }
  0xaa   :  { %v128_v38 = vpop.xlane.xlu1 %127  ;;  %v358_v53 = vrot.slane %v205_v24, %v1235_v18  ;;  %v273_v24 = vsel %vm272_vm1, %v271_v34, %v266_v21 }
  0xab   :  { %v104_v51 = vpop.xlane.xlu0 %103  ;;  %v200_v45 = vmul.f32 0.00390625, %v128_v38  ;;  %v328_v38 = vrot.slane %v199_v16, %v1241_v32 }
  0xac   :  { %v192_v6 = vmul.f32 0.00390625, %v104_v51 }
  0xad   :  { %v333_v30 = vrot.slane %v200_v45, %v1246_v20  ;;  %v329_v45 = vsel %vm279_vm2, %v328_v38, %v324_v17 }
  0xae   :  { %v167_v63 = vpop.xlane.xlu1 %166 }
  0xaf   :  { %v149_v50 = vpop.xlane.xlu0 %148  ;;  %v334_v5 = vsel %vm286_vm3, %v333_v30, %v329_v45 }
  0xb0   :  { %v207_v13 = vmul.f32 0.00390625, %v149_v50  ;;  %v285_v50 = vrot.slane %v192_v6, %v1246_v20  ;;  %v1276_v6 = vsub.s32 %v309_v58, %v1228_v47 }
  0xb2   :  { %v107_v7 = vpop.xlane.xlu1 %106  ;;  %v367_v16 = vrot.slane %v207_v13, %v1241_v32 }
  0xb3   :  { %v170_v3 = vpop.xlane.xlu0 %169  ;;  %v193_v40 = vmul.f32 0.00390625, %v107_v7  ;;  %v213_v7 = vmul.f32 0.00390625, %v167_v63  ;;  %v363_v63 = vsel %vm272_vm1, %v362_v23, %v358_v53 }
  0xb4   :  { %v214_v51 = vmul.f32 0.00390625, %v170_v3  ;;  %v368_v58 = vsel %vm279_vm2, %v367_v16, %v363_v63 }
  0xb5   :  { %v292_v3 = vrot.slane %v193_v40, %v1249_v57  ;;  %v397_v40 = vrot.slane %v213_v7, %v1235_v18 }
  0xb6   :  { %v152_v31 = vpop.xlane.xlu1 %151  ;;  %v401_v44 = vrot.slane %v214_v51, %v1238_v33 }
  0xb7   :  { %v131_v11 = vpop.xlane.xlu0 %130  ;;  %v208_v59 = vmul.f32 0.00390625, %v152_v31  ;;  %v280_v31 = vsel %vm279_vm2, %v278_v35, %v273_v24 }
  0xb8   :  { %v201_v43 = vmul.f32 0.00390625, %v131_v11  ;;  %v287_v11 = vsel %vm286_vm3, %v285_v50, %v280_v31 }
  0xb9   :  { %v372_v22 = vrot.slane %v208_v59, %v1246_v20  ;;  %v294_v38 = vsel %vm293_vm4, %v292_v3, %v287_v11 }
  0xba   :  { %v1224_v10 = vpop.xlane.xlu1 %109  ;;  %v338_v51 = vrot.slane %v201_v43, %v1249_v57 }
  0xbb   :  { %v1226_v39 = vpop.xlane.xlu0 %172  ;;  %v194_v13 = vmul.f32 0.00390625, %v1224_v10  ;;  %v402_v10 = vsel %vm272_vm1, %v401_v44, %v397_v40  ;;  %v373_v59 = vsel %vm286_vm3, %v372_v22, %v368_v58 }
  0xbc   :  { %v215_v53 = vmul.f32 0.00390625, %v1226_v39  ;;  %v339_v39 = vsel %vm293_vm4, %v338_v51, %v334_v5 }
  0xbe   :  { %v1230_v42 = vpop.xlane.xlu1 %154 }
  0xbf   :  { %v1232_v19 = vpop.xlane.xlu0 %133  ;;  %v209_v34 = vmul.f32 0.00390625, %v1230_v42  ;;  %v299_v42 = vrot.slane %v194_v13, %v1254_v62 }
  0xc0   :  { %v202_v35 = vmul.f32 0.00390625, %v1232_v19 }
  0xc1   :  { %v377_v19 = vrot.slane %v209_v34, %v1249_v57  ;;  %v301_v63 = vsel %vm300_vm5, %v299_v42, %v294_v38 }
  0xc2   :  { %v1243_v52 = vpop.xlane.xlu1 %112 }
  0xc3   :  { %v1251_v56 = vpop.xlane.xlu0 %175  ;;  %v195_v17 = vmul.f32 0.00390625, %v1243_v52  ;;  %v378_v13 = vsel %vm293_vm4, %v377_v19, %v373_v59 }
  0xc4   :  { %v216_v21 = vmul.f32 0.00390625, %v1251_v56  ;;  %v406_v56 = vrot.slane %v215_v53, %v1241_v32 }
  0xc6   :  { %v158_v54 = vpop.xlane.xlu1 %157  ;;  %v411_v52 = vrot.slane %v216_v21, %v1246_v20  ;;  %v407_v38 = vsel %vm279_vm2, %v406_v56, %v402_v10 }
  0xc7   :  { %v137_v41 = vpop.xlane.xlu0 %136  ;;  %v210_v18 = vmul.f32 0.00390625, %v158_v54  ;;  %v343_v54 = vrot.slane %v202_v35, %v1254_v62 }
  0xc8   :  { %v203_v30 = vmul.f32 0.00390625, %v137_v41 }
  0xc9   :  { %v382_v45 = vrot.slane %v210_v18, %v1254_v62  ;;  %v344_v22 = vsel %vm300_vm5, %v343_v54, %v339_v39 }
  0xca   :  { %v116_v46 = vpop.xlane.xlu1 %115  ;;  %v348_v44 = vrot.slane %v203_v30, %v1257_v55 }
  0xcb   :  { %v179_v25 = vpop.xlane.xlu0 %178  ;;  %v196_v41 = vmul.f32 0.00390625, %v116_v46  ;;  %v306_v46 = vrot.slane %v195_v17, %v1257_v55  ;;  %v383_v51 = vsel %vm300_vm5, %v382_v45, %v378_v13 }
  0xcc   :  { %v217_v16 = vmul.f32 0.00390625, %v179_v25  ;;  %v349_v35 = vsel %vm307_vm6, %v348_v44, %v344_v22  ;;  %v600_v44 = vsub.s32 0, %v1228_v47 }
  0xcd   :  { %v313_v34 = vrot.slane %v196_v41, %v1276_v6  ;;  %v308_v42 = vsel %vm307_vm6, %v306_v46, %v301_v63  ;;  %v705_v46 = vsub.s32 3, %v1228_v47 }
  0xce   :  { %v161_v33 = vpop.xlane.xlu1 %160  ;;  %v416_v11 = vrot.slane %v217_v16, %v1249_v57  ;;  %v412_v57 = vsel %vm286_vm3, %v411_v52, %v407_v38  ;;  %v635_v52 = vsub.s32 1, %v1228_v47 }
  0xcf   :  { %v140_v23 = vpop.xlane.xlu0 %139  ;;  %v211_v50 = vmul.f32 0.00390625, %v161_v33 }
  0xd0   :  { %v204_v7 = vmul.f32 0.00390625, %v140_v23 }
  0xd1   :  { %v387_v25 = vrot.slane %v211_v50, %v1257_v55  ;;  %v315_v50 = vsel %vm314_vm7, %v313_v34, %v308_v42 }
  0xd2   :  { %v164_v3 = vpop.xlane.xlu1 %163  ;;  %v353_v5 = vrot.slane %v204_v7, %v1276_v6 }
  0xd3   :  { %v212_v43 = vmul.f32 0.00390625, %v164_v3  ;;  %v182_v24 = vpop.xlane.xlu0 %181  ;;  %v388_v53 = vsel %vm307_vm6, %v387_v25, %v383_v51 }
  0xd4   :  { %v218_v31 = vmul.f32 0.00390625, %v182_v24  ;;  %v354_v18 = vsel %vm314_vm7, %v353_v5, %v349_v35  ;;  %v670_v5 = vsub.s32 2, %v1228_v47 }
  0xd5   :  { %v392_v32 = vrot.slane %v212_v43, %v1276_v6  ;;  %v434_v19 = vsel %vm433_vm8, %v354_v18, %v315_v50 }
  0xd6   :  { %v188_v40 = vpop.xlane.xlu1 %187  ;;  %v421_v33 = vrot.slane %v218_v31, %v1254_v62  ;;  %v417_v62 = vsel %vm293_vm4, %v416_v11, %v412_v57 }
  0xd7   :  { %v185_v20 = vpop.xlane.xlu0 %184  ;;  %v220_v58 = vmul.f32 0.00390625, %v188_v40  ;;  %v393_v21 = vsel %vm314_vm7, %v392_v32, %v388_v53 }
  0xd8   :  { %v219_v23 = vmul.f32 0.00390625, %v185_v20  ;;  %v422_v7 = vsel %vm300_vm5, %v421_v33, %v417_v62  ;;  %v436_v17 = vsel %vm435_vm9, %v393_v21, %v434_v19  ;;  %v1501_v62 = vld [vmem:[#allocation10_spill] sm:$0xff] }
  0xd9   :  { %v431_v30 = vrot.slane %v220_v58, %v1276_v6  ;;  %v1505_v19 = vld [vmem:[#allocation26_spill] sm:$0xff] }
  0xda   :  { %v426_v10 = vrot.slane %v219_v23, %v1257_v55  ;;  %v513_v55 = vld [vmem:[%s1409_s2] sm:$0xf]  ;;  %s981_s2 = smov [#allocation5]  }
  0xdb   :  { %918 = vmatpush3.msk.msra.mxu1 %vm518_vm12, %v513_v55  ;;  %s871_s8 = sshll.u32 %s981_s2, 4  ;;  %s872_s8 = int_to_ptr.vmem [resolvable:$true] %s871_s8 }
  0xdc   :  { %v427_v59 = vsel %vm307_vm6, %v426_v10, %v422_v7  ;;  %v1503_v10 = vld [vmem:[#allocation9_spill] sm:$0xff]  ;;  %s952_s9 = scalar_lea.vmem %s872_s8, 8192  ;;  %p957_p6 = scmp.lt.s32.totalorder %s872_s8, %s872_s8 }
  0xdd   :  { %v432_v6 = vsel %vm314_vm7, %v431_v30, %v427_v59  ;;  %v1504_v7 = vld [vmem:[#allocation25_spill] sm:$0xff]  ;;  %p953_p5 = scmp.ne.s32.totalorder %s872_s8, %s952_s9  ;;  %p958_p7 = scmp.lt.s32.totalorder %s952_s9, %s952_s9 }
  0xde   :  { %v438_v16 = vsel %vm437_vm10, %v432_v6, %v436_v17  ;;  %v1506_v6 = vld [vmem:[#allocation15_spill] sm:$0xff] }
  0xdf   :  { %915 = vmatmul.mubr.msk.f32.vlgmr.msra.gmra.mxu0 %vm439_vm11, %v438_v16  ;;  %v1507_v16 = vld [vmem:[#allocation16_spill] sm:$0xff]  ;;  %p959_p8 = por %p958_p7, %p957_p6 }
  0xe1   :  { %p960_p9 = pnand %p959_p8, %p953_p5 }
 0x19f   :  { %v508_v3 = vpop.f32.mrf.mxu0 }
 0x1a0   :  { %v512_v39 = vmax.f32 %v508_v3, 0.0  ;;  %v1508_v3 = vld [vmem:[#allocation37_spill] sm:$0xff] }
 0x1a1   :  { %v916_v54 = vpop.f32.mrf.mxu0 }
 0x1a2   :  { %920 = vmatmul.mubr.msk.f32.vlgmr.msra.gmra.mxu1 %vm514_vm13, %v512_v39  ;;  %v1509_v54 = vld [vmem:[#allocation38_spill] sm:$0xff] }
 0x262   :  { %v588_v41 = vpop.f32.mrf.mxu1 }
 0x263   :  { %v886_v43 = vmul.f32 -1.442695, %v588_v41 }
 0x264   :  { %v921_v24 = vpop.f32.mrf.mxu1 }
 0x265   :  { %928 = vpow2.f32 %v886_v43 }
 0x272   :  { %v929_v56 = vpop.eup %928 }
 0x273   :  { %v595_v45 = vadd.f32 1.0, %v929_v56  ;;  %v1510_v56 = vld [vmem:[#allocation31_spill] sm:$0xff] }
 0x275   :  { %930 = vrcp.f32 %v595_v45 }
 0x282   :  { %v931_v31 = vpop.eup %930 }
 0x283   :  { %v601_v63 = vrot.slane %v931_v31, %v600_v44  ;;  %v636_v25 = vrot.slane %v931_v31, %v635_v52  ;;  %v671_v13 = vrot.slane %v931_v31, %v670_v5  ;;  %v706_v11 = vrot.slane %v931_v31, %v705_v46  ;;  %v1511_v44 = vld [vmem:[#allocation32_spill] sm:$0xff] }
 0x285   :  { %607 = vbcast.lane.b32.xlu1 %v601_v63, 264  ;;  %603 = vbcast.lane.b32.xlu0 %v601_v63, 256 }
 0x289   :  { %611 = vbcast.lane.b32.xlu1 %v601_v63, 272  ;;  %619 = vbcast.lane.b32.xlu0 %v601_v63, 288 }
 0x28d   :  { %615 = vbcast.lane.b32.xlu1 %v601_v63, 280  ;;  %627 = vbcast.lane.b32.xlu0 %v601_v63, 304 }
 0x291   :  { %623 = vbcast.lane.b32.xlu1 %v601_v63, 296  ;;  %638 = vbcast.lane.b32.xlu0 %v636_v25, 256 }
 0x295   :  { %631 = vbcast.lane.b32.xlu1 %v601_v63, 312  ;;  %646 = vbcast.lane.b32.xlu0 %v636_v25, 272  ;;  %v1512_v63 = vld [vmem:[#allocation13_spill] sm:$0xff] }
 0x299   :  { %642 = vbcast.lane.b32.xlu1 %v636_v25, 264  ;;  %654 = vbcast.lane.b32.xlu0 %v636_v25, 288 }
 0x29d   :  { %650 = vbcast.lane.b32.xlu1 %v636_v25, 280  ;;  %662 = vbcast.lane.b32.xlu0 %v636_v25, 304 }
 0x2a1   :  { %658 = vbcast.lane.b32.xlu1 %v636_v25, 296  ;;  %673 = vbcast.lane.b32.xlu0 %v671_v13, 256 }
 0x2a5   :  { %666 = vbcast.lane.b32.xlu1 %v636_v25, 312  ;;  %681 = vbcast.lane.b32.xlu0 %v671_v13, 272  ;;  %v1513_v25 = vld [vmem:[#allocation14_spill] sm:$0xff] }
 0x2a9   :  { %677 = vbcast.lane.b32.xlu1 %v671_v13, 264  ;;  %689 = vbcast.lane.b32.xlu0 %v671_v13, 288 }
 0x2ad   :  { %685 = vbcast.lane.b32.xlu1 %v671_v13, 280  ;;  %697 = vbcast.lane.b32.xlu0 %v671_v13, 304 }
 0x2b1   :  { %693 = vbcast.lane.b32.xlu1 %v671_v13, 296  ;;  %708 = vbcast.lane.b32.xlu0 %v706_v11, 256 }
 0x2b5   :  { %701 = vbcast.lane.b32.xlu1 %v671_v13, 312  ;;  %716 = vbcast.lane.b32.xlu0 %v706_v11, 272 }
 0x2b9   :  { %712 = vbcast.lane.b32.xlu1 %v706_v11, 264  ;;  %724 = vbcast.lane.b32.xlu0 %v706_v11, 288 }
 0x2bd   :  { %720 = vbcast.lane.b32.xlu1 %v706_v11, 280  ;;  %732 = vbcast.lane.b32.xlu0 %v706_v11, 304 }
 0x2c1   :  { %728 = vbcast.lane.b32.xlu1 %v706_v11, 296 }
 0x2c5   :  { %736 = vbcast.lane.b32.xlu1 %v706_v11, 312  ;;  %v1514_v11 = vld [vmem:[#allocation43_spill] sm:$0xff] }
 0x2f7   :  { %v608_v32 = vpop.permute.xlu1 %607  ;;  %v604_v40 = vpop.permute.xlu0 %603 }
 0x2f8   :  { %v740_v22 = vmul.f32 %v608_v32, %v1024_v8  ;;  %v741_v34 = vmul.f32 %v608_v32, %v1026_v9  ;;  %v738_v47 = vmul.f32 %v604_v40, %v1012_v2  ;;  %v739_v33 = vmul.f32 %v604_v40, %v1016_v4  ;;  %v1515_v40 = vld [vmem:[#allocation44_spill] sm:$0xff] }
 0x2fa   :  { %804 = vst [vmem:[#allocation5 + $0x10] sm:$0xff] %v740_v22  ;;  %805 = vst [vmem:[#allocation5 + $0x18] sm:$0xff] %v741_v34  ;;  %v1516_v34 = vld [vmem:[#allocation19_spill] sm:$0xff] }
 0x2fb   :  { %802 = vst [vmem:[#allocation5] sm:$0xff] %v738_v47  ;;  %803 = vst [vmem:[#allocation5 + $0x8] sm:$0xff] %v739_v33  ;;  %v612_v20 = vpop.permute.xlu1 %611  ;;  %v620_v58 = vpop.permute.xlu0 %619  ;;  %v1517_v33 = vld [vmem:[#allocation20_spill] sm:$0xff] }
 0x2fc   :  { %v742_v38 = vmul.f32 %v612_v20, %v1036_v14  ;;  %v743_v51 = vmul.f32 %v612_v20, %v1038_v15  ;;  %v746_v35 = vmul.f32 %v620_v58, %v1080_v36  ;;  %v747_v8 = vmul.f32 %v620_v58, %v1082_v37 }
 0x2fe   :  { %806 = vst [vmem:[#allocation5 + $0x20] sm:$0xff] %v742_v38  ;;  %807 = vst [vmem:[#allocation5 + $0x28] sm:$0xff] %v743_v51  ;;  %v1518_v51 = vld [vmem:[#allocation11_spill] sm:$0xff] }
 0x2ff   :  { %810 = vst [vmem:[#allocation5 + $0x40] sm:$0xff] %v746_v35  ;;  %811 = vst [vmem:[#allocation5 + $0x48] sm:$0xff] %v747_v8  ;;  %v616_v2 = vpop.permute.xlu1 %615  ;;  %v628_v4 = vpop.permute.xlu0 %627  ;;  %v1519_v8 = vld [vmem:[#allocation12_spill] sm:$0xff] }
 0x300   :  { %v744_v9 = vmul.f32 %v616_v2, %v1060_v26  ;;  %v745_v23 = vmul.f32 %v616_v2, %v1062_v27  ;;  %v750_v57 = vmul.f32 %v628_v4, %v1128_v60  ;;  %v751_v14 = vmul.f32 %v628_v4, %v1130_v61  ;;  %v1520_v4 = vld [vmem:[#allocation29_spill] sm:$0xff] }
 0x302   :  { %808 = vst [vmem:[#allocation5 + $0x30] sm:$0xff] %v744_v9  ;;  %809 = vst [vmem:[#allocation5 + $0x38] sm:$0xff] %v745_v23  ;;  %v1521_v23 = vld [vmem:[#allocation30_spill] sm:$0xff] }
 0x303   :  { %814 = vst [vmem:[#allocation5 + $0x60] sm:$0xff] %v750_v57  ;;  %815 = vst [vmem:[#allocation5 + $0x68] sm:$0xff] %v751_v14  ;;  %v624_v15 = vpop.permute.xlu1 %623  ;;  %v639_v36 = vpop.permute.xlu0 %638 }
 0x304   :  { %v748_v37 = vmul.f32 %v624_v15, %v1104_v48  ;;  %v749_v53 = vmul.f32 %v624_v15, %v1106_v49  ;;  %v754_v18 = vmul.f32 %v639_v36, %v1008_v0  ;;  %v755_v26 = vmul.f32 %v639_v36, %v1010_v1  ;;  %v1502_v49 = vld [vmem:[#allocation8_spill] sm:$0xff]  ;;  %v1522_v36 = vld [vmem:[#allocation23_spill] sm:$0xff] }
 0x306   :  { %812 = vst [vmem:[#allocation5 + $0x50] sm:$0xff] %v748_v37  ;;  %813 = vst [vmem:[#allocation5 + $0x58] sm:$0xff] %v749_v53  ;;  %v1523_v53 = vld [vmem:[#allocation24_spill] sm:$0xff] }
 0x307   :  { %818 = vst [vmem:[#allocation5 + $0x80] sm:$0xff] %v754_v18  ;;  %819 = vst [vmem:[#allocation5 + $0x88] sm:$0xff] %v755_v26  ;;  %v632_v27 = vpop.permute.xlu1 %631  ;;  %v647_v60 = vpop.permute.xlu0 %646  ;;  %v1524_v26 = vld [vmem:[#allocation41_spill] sm:$0xff] }
 0x308   :  { %v752_v61 = vmul.f32 %v632_v27, %v1152_v28  ;;  %v753_v30 = vmul.f32 %v632_v27, %v1154_v29  ;;  %v758_v42 = vmul.f32 %v647_v60, %v1032_v12  ;;  %v759_v48 = vmul.f32 %v647_v60, %v1501_v62  ;;  %v1525_v60 = vld [vmem:[#allocation42_spill] sm:$0xff]  ;;  %v1526_v62 = vld [vmem:[#allocation35_spill] sm:$0xff] }
 0x30a   :  { %816 = vst [vmem:[#allocation5 + $0x70] sm:$0xff] %v752_v61  ;;  %817 = vst [vmem:[#allocation5 + $0x78] sm:$0xff] %v753_v30 }
 0x30b   :  { %822 = vst [vmem:[#allocation5 + $0xa0] sm:$0xff] %v758_v42  ;;  %823 = vst [vmem:[#allocation5 + $0xa8] sm:$0xff] %v759_v48  ;;  %v643_v0 = vpop.permute.xlu1 %642  ;;  %v655_v1 = vpop.permute.xlu0 %654 }
 0x30c   :  { %v756_v21 = vmul.f32 %v643_v0, %v1502_v49  ;;  %v757_v50 = vmul.f32 %v643_v0, %v1503_v10  ;;  %v762_v59 = vmul.f32 %v655_v1, %v1504_v7  ;;  %v763_v28 = vmul.f32 %v655_v1, %v1505_v19  ;;  %v1527_v0 = vld [vmem:[#allocation36_spill] sm:$0xff]  ;;  %v1528_v49 = vld [vmem:[#allocation17_spill] sm:$0xff]  ;;  %v1529_v10 = vld [vmem:[#allocation18_spill] sm:$0xff] }
 0x30d   :  { %v1530_v19 = vld [vmem:[#allocation45_spill] sm:$0xff] }
 0x30e   :  { %820 = vst [vmem:[#allocation5 + $0x90] sm:$0xff] %v756_v21  ;;  %821 = vst [vmem:[#allocation5 + $0x98] sm:$0xff] %v757_v50 }
 0x30f   :  { %826 = vst [vmem:[#allocation5 + $0xc0] sm:$0xff] %v762_v59  ;;  %827 = vst [vmem:[#allocation5 + $0xc8] sm:$0xff] %v763_v28  ;;  %v651_v12 = vpop.permute.xlu1 %650  ;;  %v663_v29 = vpop.permute.xlu0 %662 }
 0x310   :  { %v760_v17 = vmul.f32 %v651_v12, %v1506_v6  ;;  %v761_v55 = vmul.f32 %v651_v12, %v1507_v16  ;;  %v766_v39 = vmul.f32 %v663_v29, %v1508_v3  ;;  %v767_v41 = vmul.f32 %v663_v29, %v1509_v54  ;;  %v1531_v12 = vld [vmem:[#allocation46_spill] sm:$0xff]  ;;  %v1532_v6 = vld [vmem:[#allocation27_spill] sm:$0xff]  ;;  %v1533_v16 = vld [vmem:[#allocation28_spill] sm:$0xff] }
 0x311   :  { %v1534_v54 = vld [vmem:[#allocation21_spill] sm:$0xff] }
 0x312   :  { %824 = vst [vmem:[#allocation5 + $0xb0] sm:$0xff] %v760_v17  ;;  %825 = vst [vmem:[#allocation5 + $0xb8] sm:$0xff] %v761_v55 }
 0x313   :  { %830 = vst [vmem:[#allocation5 + $0xe0] sm:$0xff] %v766_v39  ;;  %831 = vst [vmem:[#allocation5 + $0xe8] sm:$0xff] %v767_v41  ;;  %v659_v43 = vpop.permute.xlu1 %658  ;;  %v674_v24 = vpop.permute.xlu0 %673 }
 0x314   :  { %v764_v45 = vmul.f32 %v659_v43, %v1510_v56  ;;  %v765_v31 = vmul.f32 %v659_v43, %v1511_v44  ;;  %v770_v52 = vmul.f32 %v674_v24, %v1512_v63  ;;  %v771_v5 = vmul.f32 %v674_v24, %v1513_v25  ;;  %v1535_v43 = vld [vmem:[#allocation22_spill] sm:$0xff]  ;;  %v1536_v56 = vld [vmem:[#allocation39_spill] sm:$0xff]  ;;  %v1537_v44 = vld [vmem:[#allocation40_spill] sm:$0xff] }
 0x315   :  { %v1538_v25 = vld [vmem:[#allocation33_spill] sm:$0xff] }
 0x316   :  { %828 = vst [vmem:[#allocation5 + $0xd0] sm:$0xff] %v764_v45  ;;  %829 = vst [vmem:[#allocation5 + $0xd8] sm:$0xff] %v765_v31 }
 0x317   :  { %834 = vst [vmem:[#allocation5 + $0x100] sm:$0xff] %v770_v52  ;;  %835 = vst [vmem:[#allocation5 + $0x108] sm:$0xff] %v771_v5  ;;  %v667_v13 = vpop.permute.xlu1 %666  ;;  %v682_v46 = vpop.permute.xlu0 %681 }
 0x318   :  { %v768_v32 = vmul.f32 %v667_v13, %v1514_v11  ;;  %v769_v22 = vmul.f32 %v667_v13, %v1515_v40  ;;  %v774_v47 = vmul.f32 %v682_v46, %v1516_v34  ;;  %v775_v20 = vmul.f32 %v682_v46, %v1517_v33  ;;  %v1539_v13 = vld [vmem:[#allocation34_spill] sm:$0xff]  ;;  %v1540_v11 = vld [vmem:[#allocation51_spill] sm:$0xff]  ;;  %v1541_v40 = vld [vmem:[#allocation52_spill] sm:$0xff] }
 0x31a   :  { %832 = vst [vmem:[#allocation5 + $0xf0] sm:$0xff] %v768_v32  ;;  %833 = vst [vmem:[#allocation5 + $0xf8] sm:$0xff] %v769_v22 }
 0x31b   :  { %838 = vst [vmem:[#allocation5 + $0x120] sm:$0xff] %v774_v47  ;;  %839 = vst [vmem:[#allocation5 + $0x128] sm:$0xff] %v775_v20  ;;  %v678_v58 = vpop.permute.xlu1 %677  ;;  %v690_v38 = vpop.permute.xlu0 %689  ;;  %v1542_v47 = vld [vmem:[#allocation47_spill] sm:$0xff]  ;;  %v1543_v20 = vld [vmem:[#allocation48_spill] sm:$0xff] }
 0x31c   :  { %v772_v35 = vmul.f32 %v678_v58, %v1518_v51  ;;  %v773_v2 = vmul.f32 %v678_v58, %v1519_v8  ;;  %v778_v9 = vmul.f32 %v690_v38, %v1520_v4  ;;  %v779_v57 = vmul.f32 %v690_v38, %v1521_v23  ;;  %v1544_v51 = vld [vmem:[#allocation49_spill] sm:$0xff]  ;;  %v1545_v8 = vld [vmem:[#allocation50_spill] sm:$0xff] }
 0x31e   :  { %836 = vst [vmem:[#allocation5 + $0x110] sm:$0xff] %v772_v35  ;;  %837 = vst [vmem:[#allocation5 + $0x118] sm:$0xff] %v773_v2 }
 0x31f   :  { %842 = vst [vmem:[#allocation5 + $0x140] sm:$0xff] %v778_v9  ;;  %843 = vst [vmem:[#allocation5 + $0x148] sm:$0xff] %v779_v57  ;;  %v686_v14 = vpop.permute.xlu1 %685  ;;  %v698_v15 = vpop.permute.xlu0 %697 }
 0x320   :  { %v776_v37 = vmul.f32 %v686_v14, %v1522_v36  ;;  %v777_v18 = vmul.f32 %v686_v14, %v1523_v53  ;;  %v782_v27 = vmul.f32 %v698_v15, %v1524_v26  ;;  %v783_v61 = vmul.f32 %v698_v15, %v1525_v60 }
 0x322   :  { %840 = vst [vmem:[#allocation5 + $0x130] sm:$0xff] %v776_v37  ;;  %841 = vst [vmem:[#allocation5 + $0x138] sm:$0xff] %v777_v18 }
 0x323   :  { %846 = vst [vmem:[#allocation5 + $0x160] sm:$0xff] %v782_v27  ;;  %847 = vst [vmem:[#allocation5 + $0x168] sm:$0xff] %v783_v61  ;;  %v694_v30 = vpop.permute.xlu1 %693  ;;  %v709_v42 = vpop.permute.xlu0 %708 }
 0x324   :  { %v780_v48 = vmul.f32 %v694_v30, %v1526_v62  ;;  %v781_v1 = vmul.f32 %v694_v30, %v1527_v0  ;;  %v786_v21 = vmul.f32 %v709_v42, %v1528_v49  ;;  %v787_v50 = vmul.f32 %v709_v42, %v1529_v10 }
 0x326   :  { %844 = vst [vmem:[#allocation5 + $0x150] sm:$0xff] %v780_v48  ;;  %845 = vst [vmem:[#allocation5 + $0x158] sm:$0xff] %v781_v1 }
 0x327   :  { %850 = vst [vmem:[#allocation5 + $0x180] sm:$0xff] %v786_v21  ;;  %851 = vst [vmem:[#allocation5 + $0x188] sm:$0xff] %v787_v50  ;;  %v702_v7 = vpop.permute.xlu1 %701  ;;  %v717_v59 = vpop.permute.xlu0 %716 }
 0x328   :  { %v784_v28 = vmul.f32 %v702_v7, %v1530_v19  ;;  %v785_v29 = vmul.f32 %v702_v7, %v1531_v12  ;;  %v790_v17 = vmul.f32 %v717_v59, %v1532_v6  ;;  %v791_v55 = vmul.f32 %v717_v59, %v1533_v16 }
 0x32a   :  { %848 = vst [vmem:[#allocation5 + $0x170] sm:$0xff] %v784_v28  ;;  %849 = vst [vmem:[#allocation5 + $0x178] sm:$0xff] %v785_v29 }
 0x32b   :  { %854 = vst [vmem:[#allocation5 + $0x1a0] sm:$0xff] %v790_v17  ;;  %855 = vst [vmem:[#allocation5 + $0x1a8] sm:$0xff] %v791_v55  ;;  %v713_v3 = vpop.permute.xlu1 %712  ;;  %v725_v39 = vpop.permute.xlu0 %724 }
 0x32c   :  { %v788_v41 = vmul.f32 %v713_v3, %v1534_v54  ;;  %v789_v24 = vmul.f32 %v713_v3, %v1535_v43  ;;  %v794_v45 = vmul.f32 %v725_v39, %v1536_v56  ;;  %v795_v31 = vmul.f32 %v725_v39, %v1537_v44 }
 0x32e   :  { %852 = vst [vmem:[#allocation5 + $0x190] sm:$0xff] %v788_v41  ;;  %853 = vst [vmem:[#allocation5 + $0x198] sm:$0xff] %v789_v24 }
 0x32f   :  { %858 = vst [vmem:[#allocation5 + $0x1c0] sm:$0xff] %v794_v45  ;;  %859 = vst [vmem:[#allocation5 + $0x1c8] sm:$0xff] %v795_v31  ;;  %v721_v63 = vpop.permute.xlu1 %720  ;;  %v733_v52 = vpop.permute.xlu0 %732 }
 0x330   :  { %v792_v5 = vmul.f32 %v721_v63, %v1538_v25  ;;  %v793_v46 = vmul.f32 %v721_v63, %v1539_v13  ;;  %v798_v32 = vmul.f32 %v733_v52, %v1540_v11  ;;  %v799_v22 = vmul.f32 %v733_v52, %v1541_v40 }
 0x332   :  { %856 = vst [vmem:[#allocation5 + $0x1b0] sm:$0xff] %v792_v5  ;;  %857 = vst [vmem:[#allocation5 + $0x1b8] sm:$0xff] %v793_v46 }
 0x333   :  { %862 = vst [vmem:[#allocation5 + $0x1e0] sm:$0xff] %v798_v32  ;;  %863 = vst [vmem:[#allocation5 + $0x1e8] sm:$0xff] %v799_v22  ;;  %v729_v34 = vpop.permute.xlu1 %728 }
 0x334   :  { %v796_v33 = vmul.f32 %v729_v34, %v1542_v47  ;;  %v797_v58 = vmul.f32 %v729_v34, %v1543_v20 }
 0x336   :  { %860 = vst [vmem:[#allocation5 + $0x1d0] sm:$0xff] %v796_v33  ;;  %861 = vst [vmem:[#allocation5 + $0x1d8] sm:$0xff] %v797_v58 }
 0x337   :  { %v737_v38 = vpop.permute.xlu1 %736 }
 0x338   :  { %v800_v35 = vmul.f32 %v737_v38, %v1544_v51  ;;  %v801_v2 = vmul.f32 %v737_v38, %v1545_v8 }
 0x33a   :  { %864 = vst [vmem:[#allocation5 + $0x1f0] sm:$0xff] %v800_v35  ;;  %865 = vst [vmem:[#allocation5 + $0x1f8] sm:$0xff] %v801_v2 }
 0x33b   :  { %963 = shalt.err (!%p960_p9)
}
 0x33c   :  { %877 = dma.vmem_to_hbm [thread:$0]  %s872_s8, 8192, %s1410_s3, [#allocation4], %s977_s15, %s977_s15, %s978_s16  }
 0x33d   :  { %974 = dma.done.wait [#allocation4], 8192  }
 0x33e   :  { %975 = vsyncadd [#allocation4], 4294959104 }
 0x33f   :  { %881 = vsyncpa [#allocation3], 1 }
 0x340   :  { %882 = vsyncpa [#allocation4], 1 }

</bundles_post_ra>
